<compile_context>
chip_gen: v5e
topology: v5e:2x2
jax: 0.10.0
libtpu: 0.0.40
codegen_flags: <defaults>
</compile_context>

<pallas_src>
import functools
import math

import jax
import jax.numpy as jnp
from jax.experimental import pallas as pl
from jax.experimental.pallas import tpu as pltpu


def _build_kernel(k, halo, tile_rows, w_out, cin, cout, use_next):
    """Kernel for one (batch, row-tile) grid step."""
    kk = k * k

    def _compute(slab, w, b):
        # slab: (tile_rows + halo, Wp, Cin) row band of the padded input.
        taps = []
        for dy in range(k):
            for dx in range(k):
                taps.append(slab[dy:dy + tile_rows, dx:dx + w_out, :])   # (TH, W_out, Cin)
        patches = taps[0] if kk == 1 else jnp.concatenate(taps, axis=-1)  # (TH, W_out, kk*Cin)
        # Flatten (TH, W_out) -> M rows for a single MXU matmul (in-register im2col).
        if tile_rows == 1:
            a = patches[0]
        else:
            a = jnp.concatenate([patches[t] for t in range(tile_rows)], axis=0)
        acc = jnp.dot(a, w, preferred_element_type=jnp.float32)           # (TH*W_out, Cout)
        acc = acc + b                                                      # bias (1, Cout)
        return jnp.where(acc >= 0, acc, 0.2 * acc)                         # leaky_relu(0.2)

    if use_next:
        def kernel(x0_ref, x1_ref, w_ref, b_ref, o_ref):
            # current row block + first `halo` rows of the next block
            slab = jnp.concatenate([x0_ref[0], x1_ref[0, :halo, :, :]], axis=0)
            o_ref[0] = _compute(slab, w_ref[...], b_ref[...]).astype(o_ref.dtype)
    else:
        def kernel(x0_ref, w_ref, b_ref, o_ref):
            o_ref[0] = _compute(x0_ref[0], w_ref[...], b_ref[...]).astype(o_ref.dtype)
    return kernel


def _pick_row_tile(h_out, w_out, wp, cin, cout, k):
    """Largest row tile (divisor of H_out) whose working set fits a VMEM budget."""
    halo = k - 1

    def step_bytes(th):
        in_blocks = 2 * th * wp * max(cin, 1) * 4          # x0 + x1 row bands
        patches = th * w_out * k * k * cin * 4             # in-kernel im2col matrix
        out_block = th * w_out * cout * 4
        return 2 * (in_blocks + out_block) + 2 * patches   # double buffering + temporaries

    budget = 12 * 1024 * 1024  # headroom under 32 MiB scoped VMEM (v7x: 64 MiB physical)
    divisors = [d for d in range(1, h_out + 1) if h_out % d == 0]
    tiled = [d for d in divisors
             if d < h_out and d >= max(halo, 1) and d <= 128
             and (d * w_out) % 8 == 0 and step_bytes(d) <= budget]
    if tiled:
        th = max(tiled)
    else:
        # single row tile per batch element
        # TODO(synk): fall back to manual make_async_copy row slabs if a full image
        # row band ever exceeds the VMEM budget at very large H*W*Cin.
        th = h_out
    return th, h_out // th


def _conv_leaky_relu_nhwc(x, weight, bias, k, pad):
    """x: (B, H, W, Cin) f32; weight: (Cout, Cin, k, k) (torch layout); bias: (Cout,)."""
    b_dim, h, w, cin = x.shape
    cout = weight.shape[0]
    hp, wp = h + 2 * pad, w + 2 * pad
    h_out, w_out = hp - k + 1, wp - k + 1
    halo = k - 1

    # im2col weight layout: (k, k, Cin, Cout) flattened to (k*k*Cin, Cout)
    w_mat = jnp.transpose(weight, (2, 3, 1, 0)).reshape(k * k * cin, cout)
    b_mat = bias.reshape(1, cout)

    tile_rows, nrt = _pick_row_tile(h_out, w_out, wp, cin, cout, k)
    use_next = (nrt > 1) and (halo > 0)

    # Bottom-pad so every tile_rows-row block (incl. the halo block the last row tile
    # peeks into) is a full block.
    hp_alloc = (nrt + 1) * tile_rows if use_next else max(hp, nrt * tile_rows)
    xp = jnp.pad(x, ((0, 0), (pad, pad + (hp_alloc - hp)), (pad, pad), (0, 0)))

    x0_rows = tile_rows if nrt > 1 else hp_alloc
    kernel = _build_kernel(k, halo, tile_rows, w_out, cin, cout, use_next)

    in_specs = [pl.BlockSpec((1, x0_rows, wp, cin), lambda b, i: (b, i, 0, 0))]
    args = [xp]
    if use_next:
        in_specs.append(pl.BlockSpec((1, tile_rows, wp, cin), lambda b, i: (b, i + 1, 0, 0)))
        args.append(xp)
    in_specs += [
        pl.BlockSpec((k * k * cin, cout), lambda b, i: (0, 0)),  # weights stay resident
        pl.BlockSpec((1, cout), lambda b, i: (0, 0)),            # bias stays resident
    ]
    args += [w_mat, b_mat]

    flops = 2 * b_dim * h_out * w_out * k * k * cin * cout
    bytes_accessed = 4 * (xp.size + w_mat.size + b_mat.size + b_dim * h_out * w_out * cout)

    out = pl.pallas_call(
        kernel,
        out_shape=jax.ShapeDtypeStruct((b_dim, h_out * w_out, cout), jnp.float32),
        grid=(b_dim, nrt),
        in_specs=in_specs,
        out_specs=pl.BlockSpec((1, tile_rows * w_out, cout), lambda b, i: (b, i, 0)),
        compiler_params=pltpu.CompilerParams(
            dimension_semantics=("parallel", "parallel"),
            vmem_limit_bytes=32 * 1024 * 1024,
        ),
        cost_estimate=pl.CostEstimate(
            flops=flops, transcendentals=0, bytes_accessed=bytes_accessed),
    )(*args)
    return out.reshape(b_dim, h_out, w_out, cout)


def conv_leaky_relu2d(x, weight, bias, *, padding=1, stride=1, dilation=1, groups=1):
    """Forward of ConvLeakyRelu2d: leaky_relu(conv2d(x, weight, bias), 0.2).

    x: (B, Cin, H, W) NCHW (PyTorch layout); weight: (Cout, Cin, kH, kW); bias: (Cout,).
    Returns (B, Cout, H_out, W_out) NCHW.
    """
    if stride != 1 or dilation != 1 or groups != 1:
        # TODO(synk): only the module defaults (stride=1, dilation=1, groups=1) are lowered.
        raise NotImplementedError("stride/dilation/groups != 1 not supported")
    _, cin, _, _ = x.shape
    cout, cin_w, kh, kw = weight.shape
    assert cin_w == cin and kh == kw, (weight.shape, x.shape)
    x_nhwc = jnp.transpose(x, (0, 2, 3, 1)).astype(jnp.float32)
    out_nhwc = _conv_leaky_relu_nhwc(x_nhwc, weight.astype(jnp.float32),
                                     bias.astype(jnp.float32), kh, padding)
    return jnp.transpose(out_nhwc, (0, 3, 1, 2))


if __name__ == "__main__":
    key = jax.random.PRNGKey(0)
    kx, kw, kb = jax.random.split(key, 3)

    B, Cin, H, W = 2, 4, 16, 16
    Cout, K, PAD = 16, 3, 1

    x = jax.random.normal(kx, (B, Cin, H, W), jnp.float32)
    fan_in = Cin * K * K
    bound = 1.0 / math.sqrt(fan_in)
    weight = jax.random.uniform(kw, (Cout, Cin, K, K), jnp.float32, -bound, bound)
    bias = jax.random.uniform(kb, (Cout,), jnp.float32, -bound, bound)

    fwd = jax.jit(functools.partial(conv_leaky_relu2d, padding=PAD))
    out = jax.block_until_ready(fwd(x, weight, bias))

    assert out.shape == (B, Cout, H, W), out.shape
    assert bool(jnp.all(jnp.isfinite(out)))

    # Numerical check against XLA's conv reference.
    ref = jax.lax.conv_general_dilated(
        x, weight, window_strides=(1, 1), padding=((PAD, PAD), (PAD, PAD)),
        dimension_numbers=("NCHW", "OIHW", "NCHW"),
        precision=jax.lax.Precision.HIGHEST)
    ref = ref + bias[None, :, None, None]
    ref = jnp.where(ref >= 0, ref, 0.2 * ref)
    assert bool(jnp.allclose(out, ref, atol=1e-2, rtol=1e-2)), \
        float(jnp.max(jnp.abs(out - ref)))

    print("KERNEL_OK")
</pallas_src>

<mosaic_0001>
module attributes {stable_mosaic.version = 11 : i64} {
  func.func @kernel(%arg0: i32, %arg1: i32, %arg2: memref<1x8x18x4xf32, #tpu.memory_space<vmem>>, %arg3: memref<1x8x18x4xf32, #tpu.memory_space<vmem>>, %arg4: memref<36x16xf32, #tpu.memory_space<vmem>>, %arg5: memref<1x16xf32, #tpu.memory_space<vmem>>, %arg6: memref<1x128x16xf32, #tpu.memory_space<vmem>>) attributes {dimension_semantics = [#tpu.dimension_semantics<parallel>, #tpu.dimension_semantics<parallel>], iteration_bounds = array<i64: 2, 2>, scalar_prefetch = 0 : i64, scratch_operands = 0 : i64, tpu.core_type = #tpu.core_type<tc>, window_params = [{transform_indices = @transform_0, window_bounds = array<i64: 1, 8, 18, 4>}, {transform_indices = @transform_1, window_bounds = array<i64: 1, 8, 18, 4>}, {pipeline_mode = #tpu.pipeline_mode<synchronous>, transform_indices = @transform_2, window_bounds = array<i64: 36, 16>}, {pipeline_mode = #tpu.pipeline_mode<synchronous>, transform_indices = @transform_3, window_bounds = array<i64: 1, 16>}, {transform_indices = @transform_4, window_bounds = array<i64: 1, 128, 16>}]} {
    %c0 = arith.constant 0 : index
    %c0_0 = arith.constant 0 : index
    %c0_1 = arith.constant 0 : index
    %c0_2 = arith.constant 0 : index
    %0 = vector.load %arg2[%c0, %c0_0, %c0_1, %c0_2] : memref<1x8x18x4xf32, #tpu.memory_space<vmem>>, vector<1x8x18x4xf32>
    %1 = vector.shape_cast %0 : vector<1x8x18x4xf32> to vector<8x18x4xf32>
    %c0_3 = arith.constant 0 : index
    %c0_4 = arith.constant 0 : index
    %c0_5 = arith.constant 0 : index
    %c0_6 = arith.constant 0 : index
    %2 = vector.load %arg3[%c0_3, %c0_4, %c0_5, %c0_6] : memref<1x8x18x4xf32, #tpu.memory_space<vmem>>, vector<1x2x18x4xf32>
    %3 = vector.shape_cast %2 : vector<1x2x18x4xf32> to vector<2x18x4xf32>
    %4 = tpu.concatenate %1, %3 in 0 : vector<8x18x4xf32>, vector<2x18x4xf32> -> vector<10x18x4xf32>
    %c0_7 = arith.constant 0 : index
    %c0_8 = arith.constant 0 : index
    %5 = vector.load %arg4[%c0_7, %c0_8] : memref<36x16xf32, #tpu.memory_space<vmem>>, vector<36x16xf32>
    %c0_9 = arith.constant 0 : index
    %c0_10 = arith.constant 0 : index
    %6 = vector.load %arg5[%c0_9, %c0_10] : memref<1x16xf32, #tpu.memory_space<vmem>>, vector<1x16xf32>
    %7 = vector.extract_strided_slice %4 {offsets = [0, 0, 0], sizes = [8, 16, 4], strides = [1, 1, 1]} : vector<10x18x4xf32> to vector<8x16x4xf32>
    %8 = vector.extract_strided_slice %4 {offsets = [0, 1, 0], sizes = [8, 16, 4], strides = [1, 1, 1]} : vector<10x18x4xf32> to vector<8x16x4xf32>
    %9 = vector.extract_strided_slice %4 {offsets = [0, 2, 0], sizes = [8, 16, 4], strides = [1, 1, 1]} : vector<10x18x4xf32> to vector<8x16x4xf32>
    %10 = vector.extract_strided_slice %4 {offsets = [1, 0, 0], sizes = [8, 16, 4], strides = [1, 1, 1]} : vector<10x18x4xf32> to vector<8x16x4xf32>
    %11 = vector.extract_strided_slice %4 {offsets = [1, 1, 0], sizes = [8, 16, 4], strides = [1, 1, 1]} : vector<10x18x4xf32> to vector<8x16x4xf32>
    %12 = vector.extract_strided_slice %4 {offsets = [1, 2, 0], sizes = [8, 16, 4], strides = [1, 1, 1]} : vector<10x18x4xf32> to vector<8x16x4xf32>
    %13 = vector.extract_strided_slice %4 {offsets = [2, 0, 0], sizes = [8, 16, 4], strides = [1, 1, 1]} : vector<10x18x4xf32> to vector<8x16x4xf32>
    %14 = vector.extract_strided_slice %4 {offsets = [2, 1, 0], sizes = [8, 16, 4], strides = [1, 1, 1]} : vector<10x18x4xf32> to vector<8x16x4xf32>
    %15 = vector.extract_strided_slice %4 {offsets = [2, 2, 0], sizes = [8, 16, 4], strides = [1, 1, 1]} : vector<10x18x4xf32> to vector<8x16x4xf32>
    %16 = tpu.concatenate %7, %8, %9, %10, %11, %12, %13, %14, %15 in 2 : vector<8x16x4xf32>, vector<8x16x4xf32>, vector<8x16x4xf32>, vector<8x16x4xf32>, vector<8x16x4xf32>, vector<8x16x4xf32>, vector<8x16x4xf32>, vector<8x16x4xf32>, vector<8x16x4xf32> -> vector<8x16x36xf32>
    %17 = vector.extract_strided_slice %16 {offsets = [0, 0, 0], sizes = [1, 16, 36], strides = [1, 1, 1]} : vector<8x16x36xf32> to vector<1x16x36xf32>
    %18 = vector.shape_cast %17 : vector<1x16x36xf32> to vector<16x36xf32>
    %19 = vector.extract_strided_slice %16 {offsets = [1, 0, 0], sizes = [1, 16, 36], strides = [1, 1, 1]} : vector<8x16x36xf32> to vector<1x16x36xf32>
    %20 = vector.shape_cast %19 : vector<1x16x36xf32> to vector<16x36xf32>
    %21 = vector.extract_strided_slice %16 {offsets = [2, 0, 0], sizes = [1, 16, 36], strides = [1, 1, 1]} : vector<8x16x36xf32> to vector<1x16x36xf32>
    %22 = vector.shape_cast %21 : vector<1x16x36xf32> to vector<16x36xf32>
    %23 = vector.extract_strided_slice %16 {offsets = [3, 0, 0], sizes = [1, 16, 36], strides = [1, 1, 1]} : vector<8x16x36xf32> to vector<1x16x36xf32>
    %24 = vector.shape_cast %23 : vector<1x16x36xf32> to vector<16x36xf32>
    %25 = vector.extract_strided_slice %16 {offsets = [4, 0, 0], sizes = [1, 16, 36], strides = [1, 1, 1]} : vector<8x16x36xf32> to vector<1x16x36xf32>
    %26 = vector.shape_cast %25 : vector<1x16x36xf32> to vector<16x36xf32>
    %27 = vector.extract_strided_slice %16 {offsets = [5, 0, 0], sizes = [1, 16, 36], strides = [1, 1, 1]} : vector<8x16x36xf32> to vector<1x16x36xf32>
    %28 = vector.shape_cast %27 : vector<1x16x36xf32> to vector<16x36xf32>
    %29 = vector.extract_strided_slice %16 {offsets = [6, 0, 0], sizes = [1, 16, 36], strides = [1, 1, 1]} : vector<8x16x36xf32> to vector<1x16x36xf32>
    %30 = vector.shape_cast %29 : vector<1x16x36xf32> to vector<16x36xf32>
    %31 = vector.extract_strided_slice %16 {offsets = [7, 0, 0], sizes = [1, 16, 36], strides = [1, 1, 1]} : vector<8x16x36xf32> to vector<1x16x36xf32>
    %32 = vector.shape_cast %31 : vector<1x16x36xf32> to vector<16x36xf32>
    %33 = tpu.concatenate %18, %20, %22, %24, %26, %28, %30, %32 in 0 : vector<16x36xf32>, vector<16x36xf32>, vector<16x36xf32>, vector<16x36xf32>, vector<16x36xf32>, vector<16x36xf32>, vector<16x36xf32>, vector<16x36xf32> -> vector<128x36xf32>
    %cst = arith.constant dense<0.000000e+00> : vector<128x16xf32>
    %34 = tpu.matmul %33, %5, %cst {dimension_numbers = #tpu.dot_dimension_numbers<[1], [0], [0], [1], [0, 0, 1, 1], [], []>} : vector<128x36xf32>, vector<36x16xf32>, vector<128x16xf32> -> vector<128x16xf32>
    %35 = vector.broadcast %6 : vector<1x16xf32> to vector<128x16xf32>
    %36 = arith.addf %34, %35 : vector<128x16xf32>
    %cst_11 = arith.constant 0.000000e+00 : f32
    %37 = vector.broadcast %cst_11 : f32 to vector<128x16xf32>
    %38 = arith.cmpf oge, %36, %37 : vector<128x16xf32>
    %cst_12 = arith.constant 2.000000e-01 : f32
    %39 = vector.broadcast %cst_12 : f32 to vector<128x16xf32>
    %40 = arith.mulf %39, %36 : vector<128x16xf32>
    %41 = arith.select %38, %36, %40 : vector<128x16xi1>, vector<128x16xf32>
    %c0_13 = arith.constant 0 : index
    %c0_14 = arith.constant 0 : index
    %c0_15 = arith.constant 0 : index
    %42 = vector.load %arg6[%c0_13, %c0_14, %c0_15] : memref<1x128x16xf32, #tpu.memory_space<vmem>>, vector<1x128x16xf32>
    %43 = vector.shape_cast %42 : vector<1x128x16xf32> to vector<128x16xf32>
    %44 = vector.shape_cast %41 : vector<128x16xf32> to vector<1x128x16xf32>
    tpu.vector_store %arg6[%c0_13, %c0_14, %c0_15], %44 {strides = array<i32>} : memref<1x128x16xf32, #tpu.memory_space<vmem>>, vector<1x128x16xf32>,
    return
  }
  func.func @transform_0(%arg0: i32, %arg1: i32) -> (i32, i32, i32, i32) {
    %c0_i32 = arith.constant 0 : i32
    %c0_i32_0 = arith.constant 0 : i32
    %c0_i32_1 = arith.constant 0 : i32
    return %arg0, %arg1, %c0_i32, %c0_i32_0 : i32, i32, i32, i32
  }
  func.func @transform_1(%arg0: i32, %arg1: i32) -> (i32, i32, i32, i32) {
    %c1_i32 = arith.constant 1 : i32
    %0 = arith.addi %arg1, %c1_i32 : i32
    %c0_i32 = arith.constant 0 : i32
    %c0_i32_0 = arith.constant 0 : i32
    %c0_i32_1 = arith.constant 0 : i32
    return %arg0, %0, %c0_i32, %c0_i32_0 : i32, i32, i32, i32
  }
  func.func @transform_2(%arg0: i32, %arg1: i32) -> (i32, i32) {
    %c0_i32 = arith.constant 0 : i32
    %c0_i32_0 = arith.constant 0 : i32
    %c0_i32_1 = arith.constant 0 : i32
    return %c0_i32, %c0_i32_0 : i32, i32
  }
  func.func @transform_3(%arg0: i32, %arg1: i32) -> (i32, i32) {
    %c0_i32 = arith.constant 0 : i32
    %c0_i32_0 = arith.constant 0 : i32
    %c0_i32_1 = arith.constant 0 : i32
    return %c0_i32, %c0_i32_0 : i32, i32
  }
  func.func @transform_4(%arg0: i32, %arg1: i32) -> (i32, i32, i32) {
    %c0_i32 = arith.constant 0 : i32
    %c0_i32_0 = arith.constant 0 : i32
    return %arg0, %arg1, %c0_i32 : i32, i32, i32
  }
}

</mosaic_0001>

<bundles_post_ra>
// kernel: conv_leaky_relu2d.1
= control target key start
LH: loop header
LB: loop body
LE: loop exit
PB: predicated region body
PF: predicated region fallthrough
CT: control target
= control target key end

     0   :  { %s1446_s15 = smov 0   ;;  %s1448_s16 = smov 0   ;;  %s2356_s0 = inlined_call_operand.vmem [shape: f32[2,24,18,4], index: 0, kind: input, shape index: {}, may-alias: {0,1}]   ;;  %s2357_s1 = inlined_call_operand.vmem [shape: f32[2,24,18,4], index: 1, kind: input, shape index: {}, may-alias: {0,1}]   ;;  %s2358_s2 = inlined_call_operand.vmem [shape: f32[36,16], index: 2, kind: input, shape index: {}]   ;;  %s2359_s3 = inlined_call_operand.vmem [shape: f32[1,16], index: 3, kind: input, shape index: {}]   ;;  %s2360_s4 = inlined_call_operand.vmem [shape: f32[2,256,16], index: 4, kind: output, shape index: {}]  }
   0x1   :  { %s1450_s17 = smov 0   ;;  %s1452_s18 = smov 0  }
   0x2   :  { %s1454_s19 = smov 0  }
   0x3 LB: > { %s23_s20 = sadd.s32 1, %s1403_s17  ;;  %s26_s21 = sadd.s32 1, %s1407_s18  ;;  %s1411_s19 = sphi %s1454_s19, %s14_s19   ;;  %s1407_s18 = sphi %s1452_s18, %s2374_s18   ;;  %s1403_s17 = sphi %s1450_s17, %s2373_s17   ;;  %s1399_s16 = sphi %s1448_s16, %s2372_s16   ;;  %s1395_s15 = sphi %s1446_s15, %s2371_s15  }
   0x4   : > { %p24_p0 = scmp.ge.s32.totalorder %s23_s20, 2  ;;  %p1277_p1 = scmp.ge.s32.totalorder %s1411_s19, 1 }
   0x5   : > { %p206_p2 = scmp.lt.s32.totalorder %s1411_s19, 5 }
   0x6   : > { %s2376_s20 = smov (%p24_p0, %s23_s20), 0  ;;  %s2378_s21 = smov (!%p24_p0, %s26_s21), %s1407_s18 }
   0x7   : > { %p207_p3 = pnand %p1277_p1, %p206_p2  ;;  %p28_p4 = scmp.ge.s32.totalorder %s2378_s21, 2 }
   0x9   : > { %s2380_s21 = smov (%p28_p4, %s2378_s21), 0  ;;  %210 = sbr.rel (%p207_p3) target bundleno = 614 (0x266), region = 36 }
   0xe   : > { %s1479_s22 = sshll.u32 %s1395_s15, 3  ;;  %p253_p5 = scmp.lt.s32.totalorder %s1399_s16, 1  ;;  %vm346_vm0 = vcmask 1046528   ;;  %vm435_vm1 = vcmask 1045504   ;;  %vm855_vm2 = vcmask 64512   ;;  %vm838_vm3 = vcmask 31744  }
   0xf   : > { %p255_p6 = scmp.lt.s32.totalorder %s1479_s22, 23  ;;  %s1305_s27 = sadd.s32 8, %s1479_s22  ;;  %vm872_vm4 = vcmask 97280   ;;  %vm889_vm5 = vcmask 130048   ;;  %vm1026_vm6 = vcmask 1043456   ;;  %vm906_vm7 = vcmask 162816  }
  0x10   : > { %s2382_s16 = smov (!%p253_p5, %s1399_s16), 1  ;;  %p1503_p7 = scmp.lt.s32.totalorder %s1305_s27, 23  ;;  %vm923_vm8 = vcmask 195584   ;;  %vm940_vm9 = vcmask 228352   ;;  %vm957_vm10 = vcmask 261120   ;;  %vm977_vm11 = vcmask 293888  }
  0x11   : > { %s256_s23 = scalar_select %p255_p6, %s1479_s22, 23 }
  0x12   : > { %s1322_s24 = smul.u32 72, %s2382_s16  ;;  %s1413_s7 = smov 4  }
  0x13   : > { %s1321_s25 = smul.u32 3, %s256_s23  ;;  %s2384_s27 = smov (!%p1503_p7, %s1305_s27), 23 }
  0x14   : > { %s1323_s8 = smul.u32 3, %s2384_s27  ;;  %s1414_s10 = smov 8  }
  0x15   : > { %s259_s26 = sadd.s32 %s1322_s24, %s1321_s25  ;;  %s1415_s11 = smov 12  }
  0x16   : > { %s1279_s28 = sshll.u32 %s259_s26, 3  ;;  %s1563_s9 = sadd.s32 %s1323_s8, %s1322_s24 }
  0x17   : > { %s1492_s5 = scalar_lea.vmem %s2356_s0, %s1279_s28  ;;  %s1281_s12 = sshll.u32 %s1563_s9, 3 }
  0x18   : > { %v1495_v0 = vld [vmem:[%s1492_s5 + $0x30] sm:$0xff]  ;;  %v1498_v1 = vld [vmem:[%s1492_s5 + $0x38] sm:$0xff]  ;;  %v1510_v5 = vld [vmem:[%s1492_s5 + $0x20] sm:$0xff]  ;;  %s1795_s22 = scalar_lea.vmem %s2357_s1, %s1281_s12  ;;  %s1416_s23 = smov 16  }
  0x19   : > { %v1501_v2 = vld [vmem:[%s1492_s5 + $0x18] sm:$0xff]  ;;  %v357_v3 = vrot.slane %v1495_v0, 1  ;;  %v358_v4 = vrot.slane %v1498_v1, 1  ;;  %v1514_v7 = vld [vmem:[%s1492_s5] sm:$0xff]  ;;  %v1517_v8 = vld [vmem:[%s1492_s5 + $0x8] sm:$0xff]  ;;  %v353_v9 = vrot.slane %v1510_v5, 1 }
  0x1a   : > { %v352_v6 = vrot.slane %v1501_v2, 1  ;;  %v347_v10 = vrot.slane %v1514_v7, 1  ;;  %v348_v11 = vrot.slane %v1517_v8, 1  ;;  %v1523_v12 = vld [vmem:[%s1492_s5 + $0x40] sm:$0x3]  ;;  %v1559_v25 = vld [vmem:[%s1492_s5 + $0x68] sm:$0xff] }
  0x1b   : > { %v1526_v13 = vsel %vm346_vm0, %v357_v3, %v358_v4  ;;  %v1529_v14 = vld [vmem:[%s1492_s5 + $0x28] sm:$0x3]  ;;  %v1532_v15 = vld [vmem:[%s1492_s5 + $0x10] sm:$0x3]  ;;  %v360_v18 = vrot.slane %v1523_v12, 1  ;;  %v1556_v24 = vld [vmem:[%s1492_s5 + $0x60] sm:$0xff] }
  0x1c   : > { %395 = vrot.lane.b32.xlu2 %v1526_v13, %s1413_s7  ;;  %v1537_v16 = vsel %vm346_vm0, %v352_v6, %v353_v9  ;;  %v349_v17 = vsel %vm346_vm0, %v347_v10, %v348_v11  ;;  %v355_v19 = vrot.slane %v1529_v14, 1  ;;  %v350_v20 = vrot.slane %v1532_v15, 1  ;;  %v1566_v26 = vld [vmem:[%s1492_s5 + $0x50] sm:$0xff]  ;;  %v1569_v27 = vld [vmem:[%s1492_s5 + $0x58] sm:$0x3]  ;;  %v1572_v28 = vld [vmem:[%s1492_s5 + $0x48] sm:$0xff] }
  0x1d   : > { %391 = vrot.lane.b32.xlu1 %v1537_v16, %s1413_s7  ;;  %387 = vrot.lane.b32.xlu0 %v349_v17, %s1413_s7  ;;  %v1549_v21 = vsel %vm346_vm0, %v358_v4, %v360_v18  ;;  %2365 = vst [vmem:[#allocation2_spill] sm:$0xff] %v1566_v26  ;;  %v367_v29 = vrot.slane %v1556_v24, 1  ;;  %v368_v30 = vrot.slane %v1559_v25, 1  ;;  %v363_v31 = vrot.slane %v1566_v26, 1  ;;  %v1594_v37 = vld [vmem:[%s1492_s5 + $0x80] sm:$0xff]  ;;  %v1600_v39 = vld [vmem:[%s1492_s5 + $0x78] sm:$0xff] }
  0x1e   : > { %v1552_v22 = vsel %vm346_vm0, %v353_v9, %v355_v19  ;;  %v351_v23 = vsel %vm346_vm0, %v348_v11, %v350_v20  ;;  %v365_v32 = vrot.slane %v1569_v27, 1  ;;  %v362_v33 = vrot.slane %v1572_v28, 1  ;;  %v1597_v38 = vld [vmem:[%s1492_s5 + $0x88] sm:$0x3]  ;;  %v1603_v40 = vld [vmem:[%s1492_s5 + $0x70] sm:$0x3] }
  0x1f   : > { %v1585_v34 = vsel %vm346_vm0, %v367_v29, %v368_v30  ;;  %v373_v41 = vrot.slane %v1594_v37, 1  ;;  %v375_v42 = vrot.slane %v1597_v38, 1  ;;  %v372_v43 = vrot.slane %v1600_v39, 1  ;;  %v1625_v48 = vld [vmem:[%s1492_s5 + $0xa8] sm:$0xff]  ;;  %v1628_v49 = vld [vmem:[%s1492_s5 + $0xb0] sm:$0xff]  ;;  %v1631_v50 = vld [vmem:[%s1492_s5 + $0x98] sm:$0xff] }
  0x20   : > { %v1588_v35 = vsel %vm346_vm0, %v363_v31, %v365_v32  ;;  %v1591_v36 = vsel %vm346_vm0, %v362_v33, %v363_v31  ;;  %v370_v44 = vrot.slane %v1603_v40, 1  ;;  %v1634_v51 = vld [vmem:[%s1492_s5 + $0xa0] sm:$0x3]  ;;  %v1637_v52 = vld [vmem:[%s1492_s5 + $0x90] sm:$0xff]  ;;  %v382_v53 = vrot.slane %v1625_v48, 1  ;;  %s1417_s24 = smov 20  }
  0x21   : > { %2366 = vst [vmem:[#allocation3_spill] sm:$0xff] %v1588_v35  ;;  %v1616_v45 = vsel %vm346_vm0, %v373_v41, %v375_v42  ;;  %v1619_v46 = vsel %vm346_vm0, %v372_v43, %v373_v41  ;;  %v383_v54 = vrot.slane %v1628_v49, 1  ;;  %v378_v55 = vrot.slane %v1631_v50, 1  ;;  %v1660_v61 = vld [vmem:[%s1492_s5 + $0xb8] sm:$0x3]  ;;  %s1418_s25 = smov 28  }
  0x22   : > { %2367 = vst [vmem:[#allocation4_spill] sm:$0xff] %v1616_v45  ;;  %v1622_v47 = vsel %vm346_vm0, %v368_v30, %v370_v44  ;;  %v380_v56 = vrot.slane %v1634_v51, 1  ;;  %v377_v57 = vrot.slane %v1637_v52, 1  ;;  %v437_v62 = vrot.slane %v1517_v8, 2  ;;  %s1419_s26 = smov 24   ;;  %s1420_s27 = smov 32  }
  0x23   : > { %v1651_v58 = vsel %vm346_vm0, %v382_v53, %v383_v54  ;;  %v439_v63 = vrot.slane %v1532_v15, 2  ;;  %v436_v3 = vrot.slane %v1514_v7, 2  ;;  %v385_v4 = vrot.slane %v1660_v61, 1  ;;  %s1282_s12 = sshll.u32 %s1395_s15, 4  ;;  %s1283_s13 = sshll.u32 %s2382_s16, 5 }
  0x24   : > { %397 = vrot.lane.b32.xlu2 %v1549_v21, %s1413_s7  ;;  %v1654_v59 = vsel %vm346_vm0, %v378_v55, %v380_v56  ;;  %v1657_v60 = vsel %vm346_vm0, %v377_v57, %v378_v55  ;;  %v446_v11 = vrot.slane %v1495_v0, 2  ;;  %v447_v15 = vrot.slane %v1498_v1, 2  ;;  %p279_p8 = scmp.lt.s32.totalorder %s1282_s12, 31 }
  0x25   : > { %393 = vrot.lane.b32.xlu1 %v1552_v22, %s1413_s7  ;;  %389 = vrot.lane.b32.xlu0 %v351_v23, %s1413_s7  ;;  %v440_v6 = vsel %vm435_vm1, %v437_v62, %v439_v63  ;;  %v438_v9 = vsel %vm435_vm1, %v436_v3, %v437_v62  ;;  %v1675_v10 = vsel %vm346_vm0, %v383_v54, %v385_v4  ;;  %v442_v17 = vrot.slane %v1510_v5, 2 }
  0x26   : > { %v444_v18 = vrot.slane %v1529_v14, 2  ;;  %v441_v19 = vrot.slane %v1501_v2, 2  ;;  %v1687_v20 = vsel %vm435_vm1, %v446_v11, %v447_v15  ;;  %v452_v14 = vrot.slane %v1566_v26, 2  ;;  %s2386_s12 = smov (!%p279_p8, %s1282_s12), 31 }
  0x27   : > { %v454_v30 = vrot.slane %v1569_v27, 2  ;;  %v451_v31 = vrot.slane %v1572_v28, 2  ;;  %v449_v32 = vrot.slane %v1523_v12, 2  ;;  %v461_v12 = vrot.slane %v1600_v39, 2  ;;  %s282_s15 = sadd.s32 %s1283_s13, %s2386_s12 }
  0x28   : > { %v1690_v23 = vsel %vm435_vm1, %v442_v17, %v444_v18  ;;  %v1693_v29 = vsel %vm435_vm1, %v441_v19, %v442_v17  ;;  %v462_v27 = vrot.slane %v1594_v37, 2  ;;  %v457_v43 = vrot.slane %v1559_v25, 2  ;;  %s1284_s16 = sshll.u32 %s282_s15, 3 }
  0x29   : > { %v1706_v33 = vsel %vm435_vm1, %v452_v14, %v454_v30  ;;  %v1709_v41 = vsel %vm435_vm1, %v451_v31, %v452_v14  ;;  %v1712_v42 = vsel %vm435_vm1, %v447_v15, %v449_v32  ;;  %v459_v44 = vrot.slane %v1603_v40, 2  ;;  %v1798_v31 = vld [vmem:[%s1795_s22 + $0x8] sm:$0xff]  ;;  %v1801_v32 = vld [vmem:[%s1795_s22] sm:$0xff] }
  0x2a   : > { %v456_v53 = vrot.slane %v1556_v24, 2  ;;  %v1726_v54 = vsel %vm435_vm1, %v461_v12, %v462_v27  ;;  %v467_v40 = vrot.slane %v1631_v50, 2  ;;  %v469_v57 = vrot.slane %v1634_v51, 2 }
  0x2b   : > { %v1729_v55 = vsel %vm435_vm1, %v457_v43, %v459_v44  ;;  %v466_v62 = vrot.slane %v1637_v52, 2  ;;  %v464_v63 = vrot.slane %v1597_v38, 2  ;;  %v472_v38 = vrot.slane %v1628_v49, 2 }
  0x2c   : > { %403 = vrot.lane.b32.xlu2 %v1585_v34, %s1413_s7  ;;  %v1732_v56 = vsel %vm435_vm1, %v456_v53, %v457_v43  ;;  %v1745_v3 = vsel %vm435_vm1, %v467_v40, %v469_v57  ;;  %v474_v51 = vrot.slane %v1660_v61, 2 }
  0x2d   : > { %401 = vrot.lane.b32.xlu1 %v1588_v35, %s1413_s7  ;;  %399 = vrot.lane.b32.xlu0 %v1591_v36, %s1413_s7  ;;  %v1748_v4 = vsel %vm435_vm1, %v466_v62, %v467_v40 }
  0x2e   : > { %v1763_v11 = vsel %vm435_vm1, %v472_v38, %v474_v51 }
  0x34   : > { %409 = vrot.lane.b32.xlu2 %v1616_v45, %s1413_s7 }
  0x35   : > { %407 = vrot.lane.b32.xlu1 %v1619_v46, %s1413_s7  ;;  %405 = vrot.lane.b32.xlu0 %v1622_v47, %s1413_s7 }
  0x3c   : > { %415 = vrot.lane.b32.xlu2 %v1651_v58, %s1413_s7 }
  0x3d   : > { %413 = vrot.lane.b32.xlu1 %v1654_v59, %s1413_s7  ;;  %411 = vrot.lane.b32.xlu0 %v1657_v60, %s1413_s7 }
  0x44   : > { %478 = vrot.lane.b32.xlu2 %v440_v6, %s1414_s10  ;;  %v1751_v6 = vsel %vm435_vm1, %v462_v27, %v464_v63 }
  0x45   : > { %476 = vrot.lane.b32.xlu1 %v438_v9, %s1414_s10  ;;  %417 = vrot.lane.b32.xlu0 %v1675_v10, %s1413_s7  ;;  %v471_v9 = vrot.slane %v1625_v48, 2 }
  0x47   : > { %v1766_v15 = vsel %vm435_vm1, %v471_v9, %v472_v38 }
  0x4c   : > { %484 = vrot.lane.b32.xlu2 %v1687_v20, %s1414_s10 }
  0x4d   : > { %482 = vrot.lane.b32.xlu1 %v1690_v23, %s1414_s10  ;;  %480 = vrot.lane.b32.xlu0 %v1693_v29, %s1414_s10 }
  0x54   : > { %490 = vrot.lane.b32.xlu2 %v1706_v33, %s1414_s10 }
  0x55   : > { %488 = vrot.lane.b32.xlu1 %v1709_v41, %s1414_s10  ;;  %486 = vrot.lane.b32.xlu0 %v1712_v42, %s1414_s10 }
  0x5c   : > { %496 = vrot.lane.b32.xlu2 %v1726_v54, %s1414_s10 }
  0x5d   : > { %494 = vrot.lane.b32.xlu1 %v1729_v55, %s1414_s10  ;;  %492 = vrot.lane.b32.xlu0 %v1732_v56, %s1414_s10 }
  0x64   : > { %502 = vrot.lane.b32.xlu2 %v1745_v3, %s1414_s10 }
  0x65   : > { %500 = vrot.lane.b32.xlu1 %v1748_v4, %s1414_s10  ;;  %498 = vrot.lane.b32.xlu0 %v1751_v6, %s1414_s10 }
  0x6c   : > { %526 = vrot.lane.b32.xlu2 %v1501_v2, %s1415_s11 }
  0x6d   : > { %506 = vrot.lane.b32.xlu1 %v1763_v11, %s1414_s10  ;;  %504 = vrot.lane.b32.xlu0 %v1766_v15, %s1414_s10 }
  0x74   : > { %532 = vrot.lane.b32.xlu2 %v1498_v1, %s1415_s11 }
  0x75   : > { %530 = vrot.lane.b32.xlu1 %v1495_v0, %s1415_s11  ;;  %528 = vrot.lane.b32.xlu0 %v1510_v5, %s1415_s11 }
  0x76   : > { %v396_v61 = vpop.permute.xlu2 %395 }
  0x7c   : > { %538 = vrot.lane.b32.xlu2 %v1556_v24, %s1415_s11 }
  0x7d   : > { %536 = vrot.lane.b32.xlu1 %v1566_v26, %s1415_s11  ;;  %534 = vrot.lane.b32.xlu0 %v1572_v28, %s1415_s11 }
  0x7e   : > { %v1779_v17 = vpop.permute.xlu2 %397 }
  0x84   : > { %544 = vrot.lane.b32.xlu2 %v1594_v37, %s1415_s11 }
  0x85   : > { %542 = vrot.lane.b32.xlu1 %v1600_v39, %s1415_s11  ;;  %540 = vrot.lane.b32.xlu0 %v1559_v25, %s1415_s11 }
  0x86   : > { %v1784_v18 = vpop.permute.xlu2 %403 }
  0x8c   : > { %550 = vrot.lane.b32.xlu2 %v1625_v48, %s1415_s11 }
  0x8d   : > { %548 = vrot.lane.b32.xlu1 %v1631_v50, %s1415_s11  ;;  %546 = vrot.lane.b32.xlu0 %v1637_v52, %s1415_s11 }
  0x8e   : > { %v1790_v19 = vpop.permute.xlu2 %409 }
  0x8f   : > { %v392_v14 = vpop.permute.xlu1 %391  ;;  %v388_v30 = vpop.permute.xlu0 %387 }
  0x94   : > { %556 = vrot.lane.b32.xlu2 %v1798_v31, %s1415_s11 }
  0x95   : > { %554 = vrot.lane.b32.xlu1 %v1801_v32, %s1415_s11  ;;  %552 = vrot.lane.b32.xlu0 %v1628_v49, %s1415_s11 }
  0x96   : > { %v1806_v12 = vpop.permute.xlu2 %415 }
  0x97   : > { %v394_v27 = vpop.permute.xlu1 %393  ;;  %v390_v43 = vpop.permute.xlu0 %389 }
  0x98   : > { %v840_v44 = vsel %vm838_vm3, %v1517_v8, %v390_v43 }
  0x9c   : > { %584 = vrot.lane.b32.xlu2 %v1526_v13, %s1416_s23 }
  0x9d   : > { %582 = vrot.lane.b32.xlu1 %v1552_v22, %s1416_s23  ;;  %580 = vrot.lane.b32.xlu0 %v1537_v16, %s1416_s23  ;;  %v843_v16 = vsel %vm838_vm3, %v1495_v0, %v396_v61 }
  0x9e   : > { %v479_v53 = vpop.permute.xlu2 %478 }
  0x9f   : > { %v402_v40 = vpop.permute.xlu1 %401  ;;  %v1817_v57 = vsel %vm855_vm2, %v840_v44, %v479_v53  ;;  %v400_v62 = vpop.permute.xlu0 %399 }
  0xa0   : > { %v846_v51 = vsel %vm838_vm3, %v1566_v26, %v402_v40  ;;  %v839_v40 = vsel %vm838_vm3, %v1514_v7, %v388_v30 }
  0xa4   : > { %590 = vrot.lane.b32.xlu2 %v1588_v35, %s1416_s23 }
  0xa5   : > { %588 = vrot.lane.b32.xlu1 %v1591_v36, %s1416_s23  ;;  %586 = vrot.lane.b32.xlu0 %v1549_v21, %s1416_s23 }
  0xa6   : > { %v485_v22 = vpop.permute.xlu2 %484 }
  0xa7   : > { %v408_v8 = vpop.permute.xlu1 %407  ;;  %v1828_v63 = vsel %vm855_vm2, %v843_v16, %v485_v22  ;;  %v406_v38 = vpop.permute.xlu0 %405 }
  0xa8   : > { %v849_v53 = vsel %vm838_vm3, %v1600_v39, %v408_v8  ;;  %v841_v8 = vsel %vm838_vm3, %v1501_v2, %v392_v14  ;;  %v628_v2 = vrot.slane %v1801_v32, 2 }
  0xac   : > { %596 = vrot.lane.b32.xlu2 %v1619_v46, %s1416_s23 }
  0xad   : > { %594 = vrot.lane.b32.xlu1 %v1622_v47, %s1416_s23  ;;  %592 = vrot.lane.b32.xlu0 %v1585_v34, %s1416_s23 }
  0xae   : > { %v491_v9 = vpop.permute.xlu2 %490 }
  0xaf   : > { %v414_v61 = vpop.permute.xlu1 %413  ;;  %v1839_v43 = vsel %vm855_vm2, %v846_v51, %v491_v9  ;;  %v412_v44 = vpop.permute.xlu0 %411 }
  0xb0   : > { %v852_v7 = vsel %vm838_vm3, %v1631_v50, %v414_v61  ;;  %v576_v61 = vrot.slane %v1798_v31, 1 }
  0xb4   : > { %602 = vrot.lane.b32.xlu2 %v1654_v59, %s1416_s23 }
  0xb5   : > { %600 = vrot.lane.b32.xlu1 %v1657_v60, %s1416_s23  ;;  %598 = vrot.lane.b32.xlu0 %v1616_v45, %s1416_s23 }
  0xb6   : > { %v497_v16 = vpop.permute.xlu2 %496 }
  0xb7   : > { %v1852_v22 = vsel %vm855_vm2, %v849_v53, %v497_v16  ;;  %v477_v51 = vpop.permute.xlu1 %476  ;;  %v1854_v9 = vpop.permute.xlu0 %417  ;;  %v842_v53 = vsel %vm838_vm3, %v1510_v5, %v394_v27  ;;  %v629_v5 = vrot.slane %v1798_v31, 2  ;;  %v575_v27 = vrot.slane %v1801_v32, 1 }
  0xb8   : > { %v856_v35 = vsel %vm855_vm2, %v839_v40, %v477_v51 }
  0xbc   : > { %657 = vrot.lane.b32.xlu2 %v1766_v15, %s1417_s24 }
  0xbd   : > { %649 = vrot.lane.b32.xlu1 %v1726_v54, %s1417_s24  ;;  %604 = vrot.lane.b32.xlu0 %v1651_v58, %s1416_s23 }
  0xbe   : > { %v503_v30 = vpop.permute.xlu2 %502 }
  0xbf   : > { %v1870_v16 = vsel %vm855_vm2, %v852_v7, %v503_v30  ;;  %v483_v40 = vpop.permute.xlu1 %482  ;;  %v481_v51 = vpop.permute.xlu0 %480  ;;  %v845_v7 = vsel %vm838_vm3, %v1572_v28, %v400_v62  ;;  %v847_v62 = vsel %vm838_vm3, %v1556_v24, %v1784_v18 }
  0xc0   : > { %v859_v45 = vsel %vm855_vm2, %v842_v53, %v483_v40  ;;  %v1874_v26 = vsel %vm855_vm2, %v841_v8, %v481_v51 }
  0xc4   : > { %753 = vrot.lane.b32.xlu2 %v1657_v60, %s1418_s25  ;;  %v844_v60 = vsel %vm838_vm3, %v1498_v1, %v1779_v17  ;;  %v1904_v17 = vsel %vm346_vm0, %v575_v27, %v576_v61 }
  0xc5   : > { %707 = vrot.lane.b32.xlu1 %v1801_v32, %s1419_s26  ;;  %699 = vrot.lane.b32.xlu0 %v1637_v52, %s1419_s26  ;;  %v1899_v32 = vsel %vm435_vm1, %v628_v2, %v629_v5  ;;  %v848_v2 = vsel %vm838_vm3, %v1559_v25, %v406_v38  ;;  %v851_v38 = vsel %vm838_vm3, %v1637_v52, %v412_v44 }
  0xc6   : > { %v527_v14 = vpop.permute.xlu2 %526  ;;  %v853_v52 = vsel %vm838_vm3, %v1625_v48, %v1806_v12 }
  0xc7   : > { %v1892_v30 = vsel %vm872_vm4, %v856_v35, %v527_v14  ;;  %v489_v8 = vpop.permute.xlu1 %488  ;;  %v487_v53 = vpop.permute.xlu0 %486 }
  0xc8   : > { %v862_v40 = vsel %vm855_vm2, %v845_v7, %v489_v8  ;;  %v861_v51 = vsel %vm855_vm2, %v844_v60, %v487_v53 }
  0xcc   : > { %814 = vrot.lane.b32.xlu2 %v1899_v32, %s1420_s27 }
  0xcd   : > { %806 = vrot.lane.b32.xlu1 %v1748_v4, %s1420_s27  ;;  %761 = vrot.lane.b32.xlu0 %v1904_v17, %s1418_s25 }
  0xce   : > { %v533_v35 = vpop.permute.xlu2 %532 }
  0xcf   : > { %v1918_v14 = vsel %vm872_vm4, %v859_v45, %v533_v35  ;;  %v495_v27 = vpop.permute.xlu1 %494  ;;  %v493_v60 = vpop.permute.xlu0 %492  ;;  %v850_v45 = vsel %vm838_vm3, %v1594_v37, %v1790_v19  ;;  %v854_v19 = vsel %vm838_vm3, %v1628_v49, %v1854_v9 }
  0xd0   : > { %v865_v7 = vsel %vm855_vm2, %v848_v2, %v495_v27  ;;  %v864_v8 = vsel %vm855_vm2, %v847_v62, %v493_v60 }
  0xd4   : > { %606 = vrot.lane.b32.xlu2 %v1675_v10, %s1416_s23 }
  0xd5   : > { %641 = vrot.lane.b32.xlu1 %v1709_v41, %s1417_s24  ;;  %633 = vrot.lane.b32.xlu0 %v1693_v29, %s1417_s24 }
  0xd6   : > { %v539_v18 = vpop.permute.xlu2 %538 }
  0xd7   : > { %v1934_v53 = vsel %vm872_vm4, %v862_v40, %v539_v18  ;;  %v501_v35 = vpop.permute.xlu1 %500  ;;  %v499_v62 = vpop.permute.xlu0 %498 }
  0xd8   : > { %v868_v2 = vsel %vm855_vm2, %v851_v38, %v501_v35  ;;  %v867_v27 = vsel %vm855_vm2, %v850_v45, %v499_v62  ;;  %v312_v35 = vld [vmem:[%s1795_s22 + $0x10] sm:$0x3] }
  0xdc   : > { %651 = vrot.lane.b32.xlu2 %v1751_v6, %s1417_s24 }
  0xdd   : > { %691 = vrot.lane.b32.xlu1 %v1556_v24, %s1419_s26  ;;  %683 = vrot.lane.b32.xlu0 %v1495_v0, %s1419_s26 }
  0xde   : > { %v545_v29 = vpop.permute.xlu2 %544 }
  0xdf   : > { %v1951_v44 = vsel %vm872_vm4, %v865_v7, %v545_v29  ;;  %v507_v40 = vpop.permute.xlu1 %506  ;;  %v505_v60 = vpop.permute.xlu0 %504 }
  0xe0   : > { %v871_v24 = vsel %vm855_vm2, %v854_v19, %v507_v40  ;;  %v870_v18 = vsel %vm855_vm2, %v853_v52, %v505_v60 }
  0xe4   : > { %745 = vrot.lane.b32.xlu2 %v1585_v34, %s1418_s25 }
  0xe5   : > { %737 = vrot.lane.b32.xlu1 %v1526_v13, %s1418_s25  ;;  %659 = vrot.lane.b32.xlu0 %v1763_v11, %s1417_s24  ;;  %v578_v13 = vrot.slane %v312_v35, 1 }
  0xe6   : > { %v551_v0 = vpop.permute.xlu2 %550 }
  0xe7   : > { %v1962_v12 = vsel %vm872_vm4, %v868_v2, %v551_v0  ;;  %v531_v9 = vpop.permute.xlu1 %530  ;;  %v529_v7 = vpop.permute.xlu0 %528  ;;  %v1984_v52 = vsel %vm346_vm0, %v576_v61, %v578_v13  ;;  %v313_v13 = vld [vmem:[%s1795_s22 + $0x18] sm:$0xff] }
  0xe8   : > { %v875_v45 = vsel %vm872_vm4, %v1874_v26, %v531_v9  ;;  %v874_v38 = vsel %vm872_vm4, %v1817_v57, %v529_v7 }
  0xec   : > { %790 = vrot.lane.b32.xlu2 %v1687_v20, %s1420_s27 }
  0xed   : > { %709 = vrot.lane.b32.xlu1 %v1798_v31, %s1419_s26  ;;  %701 = vrot.lane.b32.xlu0 %v1631_v50, %s1419_s26 }
  0xee   : > { %v557_v34 = vpop.permute.xlu2 %556 }
  0xef   : > { %v1976_v62 = vsel %vm872_vm4, %v871_v24, %v557_v34  ;;  %v537_v2 = vpop.permute.xlu1 %536  ;;  %v535_v26 = vpop.permute.xlu0 %534  ;;  %v2078_v34 = vld [vmem:[%s1795_s22 + $0x20] sm:$0xff] }
  0xf0   : > { %v878_v29 = vsel %vm872_vm4, %v861_v51, %v537_v2  ;;  %v877_v57 = vsel %vm872_vm4, %v1828_v63, %v535_v26  ;;  %v631_v51 = vrot.slane %v312_v35, 2  ;;  %v732_v2 = vrot.slane %v313_v13, 1 }
  0xf4   : > { %763 = vrot.lane.b32.xlu2 %v1984_v52, %s1418_s25 }
  0xf5   : > { %755 = vrot.lane.b32.xlu1 %v1654_v59, %s1418_s25  ;;  %798 = vrot.lane.b32.xlu0 %v1732_v56, %s1420_s27  ;;  %v2005_v59 = vsel %vm435_vm1, %v629_v5, %v631_v51  ;;  %v316_v51 = vld [vmem:[%s2358_s2] sm:$0xff] }
  0xf6   : > { %v585_v50 = vpop.permute.xlu2 %584 }
  0xf7   : > { %v1993_v19 = vsel %vm889_vm5, %v875_v45, %v585_v50  ;;  %v543_v63 = vpop.permute.xlu1 %542  ;;  %v541_v40 = vpop.permute.xlu0 %540 }
  0xf8   : > { %v1996_v61 = vsel %vm872_vm4, %v864_v8, %v543_v63  ;;  %v2000_v60 = vsel %vm872_vm4, %v1839_v43, %v541_v40 }
  0xfc   : > { %635 = vrot.lane.b32.xlu2 %v1690_v23, %s1417_s24 }
  0xfd   : > { %816 = vrot.lane.b32.xlu1 %v2005_v59, %s1420_s27  ;;  %808 = vrot.lane.b32.xlu0 %v1745_v3, %s1420_s27 }
  0xfe   : > { %v591_v8 = vpop.permute.xlu2 %590 }
  0xff   : > { %v2014_v24 = vsel %vm889_vm5, %v878_v29, %v591_v8  ;;  %v549_v43 = vpop.permute.xlu1 %548  ;;  %v547_v0 = vpop.permute.xlu0 %546  ;;  %v733_v29 = vrot.slane %v2078_v34, 1 }
 0x100   : > { %v884_v31 = vsel %vm872_vm4, %v867_v27, %v549_v43  ;;  %v2019_v5 = vsel %vm872_vm4, %v1852_v22, %v547_v0  ;;  %v786_v43 = vrot.slane %v2078_v34, 2 }
 0x101   : > { %v734_v8 = vsel %vm346_vm0, %v732_v2, %v733_v29 }
 0x104   : > { %685 = vrot.lane.b32.xlu2 %v1498_v1, %s1419_s26 }
 0x105   : > { %608 = vrot.lane.b32.xlu1 %v1904_v17, %s1416_s23  ;;  %643 = vrot.lane.b32.xlu0 %v1706_v33, %s1417_s24 }
 0x106   : > { %v2027_v23 = vpop.permute.xlu2 %596 }
 0x107   : > { %v555_v9 = vpop.permute.xlu1 %554  ;;  %v553_v7 = vpop.permute.xlu0 %552 }
 0x108   : > { %v2030_v45 = vsel %vm872_vm4, %v870_v18, %v555_v9  ;;  %v2034_v22 = vsel %vm872_vm4, %v1870_v16, %v553_v7 }
 0x10c   : > { %661 = vrot.lane.b32.xlu2 %v1899_v32, %s1417_s24 }
 0x10d   : > { %653 = vrot.lane.b32.xlu1 %v1748_v4, %s1417_s24  ;;  %693 = vrot.lane.b32.xlu0 %v1559_v25, %s1419_s26 }
 0x10e   : > { %v603_v1 = vpop.permute.xlu2 %602 }
 0x10f   : > { %v2043_v17 = vsel %vm889_vm5, %v884_v31, %v603_v1  ;;  %v583_v27 = vpop.permute.xlu1 %582  ;;  %v581_v18 = vpop.permute.xlu0 %580 }
 0x110   : > { %v2046_v35 = vsel %vm889_vm5, %v874_v38, %v583_v27  ;;  %v2050_v16 = vsel %vm889_vm5, %v1892_v30, %v581_v18  ;;  %v320_v30 = vld [vmem:[%s2358_s2 + $0x20] sm:$0xf] }
 0x111   : > { %1307 = vmatpush.msk.msra.mxu2 %vm1026_vm6, %v320_v30  ;;  %1308 = vmatpush.msk.msra.mxu3 %vm1026_vm6, %v320_v30 }
 0x112   : > { %1285 = vmatpush.msk.msra.mxu0 %vm1026_vm6, %v320_v30  ;;  %1306 = vmatpush.msk.msra.mxu1 %vm1026_vm6, %v320_v30 }
 0x114   : > { %703 = vrot.lane.b32.xlu2 %v1625_v48, %s1419_s26 }
 0x115   : > { %747 = vrot.lane.b32.xlu1 %v1622_v47, %s1418_s25  ;;  %739 = vrot.lane.b32.xlu0 %v1549_v21, %s1418_s25  ;;  %v319_v21 = vld [vmem:[%s2358_s2 + $0x18] sm:$0xff]  ;;  %v318_v47 = vld [vmem:[%s2358_s2 + $0x10] sm:$0xff] }
 0x116   : > { %v2058_v25 = vpop.permute.xlu2 %657  ;;  %1310 = vmatpush.msra.mxu2 %v319_v21  ;;  %1311 = vmatpush.msra.mxu3 %v319_v21 }
 0x117   : > { %v589_v4 = vpop.permute.xlu1 %588  ;;  %v587_v32 = vpop.permute.xlu0 %586  ;;  %1042 = vmatpush.msra.mxu0 %v319_v21  ;;  %1309 = vmatpush.msra.mxu1 %v319_v21 }
 0x118   : > { %v2064_v38 = vsel %vm889_vm5, %v877_v57, %v589_v4  ;;  %v2068_v48 = vsel %vm889_vm5, %v1918_v14, %v587_v32  ;;  %1313 = vmatpush.msra.mxu2 %v318_v47  ;;  %v317_v14 = vld [vmem:[%s2358_s2 + $0x8] sm:$0xff]  ;;  %1314 = vmatpush.msra.mxu3 %v318_v47 }
 0x119   : > { %1043 = vmatpush.msra.mxu0 %v318_v47  ;;  %1312 = vmatpush.msra.mxu1 %v318_v47  ;;  %v315_v47 = vld [vmem:[%s1795_s22 + $0x28] sm:$0x3] }
 0x11a   : > { %1316 = vmatpush.msra.mxu2 %v317_v14  ;;  %1317 = vmatpush.msra.mxu3 %v317_v14 }
 0x11b   : > { %1044 = vmatpush.msra.mxu0 %v317_v14  ;;  %1315 = vmatpush.msra.mxu1 %v317_v14  ;;  %v735_v14 = vrot.slane %v315_v47, 1 }
 0x11c   : > { %800 = vrot.lane.b32.xlu2 %v1729_v55, %s1420_s27  ;;  %1319 = vmatpush.msra.mxu2 %v316_v51 }
 0x11d   : > { %792 = vrot.lane.b32.xlu1 %v1712_v42, %s1420_s27  ;;  %711 = vrot.lane.b32.xlu0 %v313_v13, %s1419_s26 }
 0x11e   : > { %v754_v26 = vpop.permute.xlu2 %753  ;;  %1320 = vmatpush.msra.mxu3 %v316_v51  ;;  %1045 = vmatpush.msra.mxu0 %v316_v51 }
 0x11f   : > { %v595_v57 = vpop.permute.xlu1 %594  ;;  %v593_v50 = vpop.permute.xlu0 %592  ;;  %1318 = vmatpush.msra.mxu1 %v316_v51 }
 0x120   : > { %v2094_v63 = vsel %vm889_vm5, %v2000_v60, %v595_v57  ;;  %v2098_v40 = vsel %vm889_vm5, %v1934_v53, %v593_v50  ;;  %v785_v53 = vrot.slane %v313_v13, 2  ;;  %v788_v13 = vrot.slane %v315_v47, 2 }
 0x121   : > { %v736_v57 = vsel %vm346_vm0, %v733_v29, %v735_v14 }
 0x124   : > { %810 = vrot.lane.b32.xlu2 %v1766_v15, %s1420_s27  ;;  %v787_v15 = vsel %vm435_vm1, %v785_v53, %v786_v43 }
 0x125   : > { %765 = vrot.lane.b32.xlu1 %v734_v8, %s1418_s25  ;;  %757 = vrot.lane.b32.xlu0 %v1651_v58, %s1418_s25  ;;  %v2368_v8 = vld [vmem:[#allocation2_spill] sm:$0xff] }
 0x126   : > { %v815_v60 = vpop.permute.xlu2 %814 }
 0x127   : > { %v601_v0 = vpop.permute.xlu1 %600  ;;  %v599_v31 = vpop.permute.xlu0 %598 }
 0x128   : > { %v2111_v9 = vsel %vm889_vm5, %v2019_v5, %v601_v0  ;;  %v2115_v7 = vsel %vm889_vm5, %v1951_v44, %v599_v31  ;;  %v2370_v0 = vld [vmem:[#allocation3_spill] sm:$0xff] }
 0x12c   : > { %645 = vrot.lane.b32.xlu2 %v1732_v56, %s1417_s24 }
 0x12d   : > { %637 = vrot.lane.b32.xlu1 %v1687_v20, %s1417_s24  ;;  %818 = vrot.lane.b32.xlu0 %v787_v15, %s1420_s27  ;;  %v898_v20 = vsel %vm889_vm5, %v1996_v61, %v2027_v23 }
 0x12e   : > { %v2123_v58 = vpop.permute.xlu2 %606 }
 0x12f   : > { %v650_v1 = vpop.permute.xlu1 %649  ;;  %v605_v27 = vpop.permute.xlu0 %604 }
 0x130   : > { %v915_v18 = vsel %vm906_vm7, %v898_v20, %v650_v1 }
 0x134   : > { %695 = vrot.lane.b32.xlu2 %v1600_v39, %s1419_s26  ;;  %v902_v39 = vsel %vm889_vm5, %v1962_v12, %v605_v27 }
 0x135   : > { %687 = vrot.lane.b32.xlu1 %v1572_v28, %s1419_s26  ;;  %610 = vrot.lane.b32.xlu0 %v1984_v52, %s1416_s23  ;;  %v919_v52 = vsel %vm906_vm7, %v902_v39, %v2058_v25 }
 0x136   : > { %v2131_v44 = vpop.permute.xlu2 %651 }
 0x137   : > { %v708_v56 = vpop.permute.xlu1 %707  ;;  %v700_v5 = vpop.permute.xlu0 %699 }
 0x138   : > { %v932_v28 = vsel %vm923_vm8, %v915_v18, %v700_v5  ;;  %v936_v12 = vsel %vm923_vm8, %v919_v52, %v708_v56 }
 0x139   : > { %v949_v32 = vsel %vm940_vm9, %v932_v28, %v754_v26  ;;  %v789_v26 = vsel %vm435_vm1, %v786_v43, %v788_v13  ;;  %v2369_v43 = vld [vmem:[#allocation4_spill] sm:$0xff] }
 0x13c   : > { %741 = vrot.lane.b32.xlu2 %v1591_v36, %s1418_s25 }
 0x13d   : > { %663 = vrot.lane.b32.xlu1 %v2005_v59, %s1417_s24  ;;  %655 = vrot.lane.b32.xlu0 %v1745_v3, %s1417_s24 }
 0x13e   : > { %v746_v61 = vpop.permute.xlu2 %745 }
 0x13f   : > { %v807_v23 = vpop.permute.xlu1 %806  ;;  %v762_v4 = vpop.permute.xlu0 %761 }
 0x140   : > { %v953_v36 = vsel %vm940_vm9, %v936_v12, %v762_v4  ;;  %v966_v59 = vsel %vm957_vm10, %v949_v32, %v807_v23 }
 0x141   : > { %1294 = vmatmul.msk.f32.vlgmr.msra.gmra.mxu2 %vm977_vm11, %v966_v59  ;;  %v970_v3 = vsel %vm957_vm10, %v953_v36, %v815_v60 }
 0x142   : > { %1298 = vmatmul.msk.f32.vlgmr.msra.gmra.mxu3 %vm977_vm11, %v970_v3 }
 0x144   : > { %713 = vrot.lane.b32.xlu2 %v2078_v34, %s1419_s26 }
 0x145   : > { %705 = vrot.lane.b32.xlu1 %v1628_v49, %s1419_s26  ;;  %749 = vrot.lane.b32.xlu0 %v1619_v46, %s1418_s25 }
 0x146   : > { %v791_v21 = vpop.permute.xlu2 %790 }
 0x147   : > { %v642_v25 = vpop.permute.xlu1 %641  ;;  %v634_v30 = vpop.permute.xlu0 %633 }
 0x148   : > { %v911_v53 = vsel %vm906_vm7, %v2064_v38, %v642_v25  ;;  %v903_v38 = vsel %vm889_vm5, %v2034_v22, %v2123_v58 }
 0x14c   : > { %759 = vrot.lane.b32.xlu2 %v1675_v10, %s1418_s25  ;;  %v907_v10 = vsel %vm906_vm7, %v2050_v16, %v634_v30 }
 0x14d   : > { %802 = vrot.lane.b32.xlu1 %v1726_v54, %s1420_s27  ;;  %794 = vrot.lane.b32.xlu0 %v1709_v41, %s1420_s27 }
 0x14e   : > { %v764_v46 = vpop.permute.xlu2 %763 }
 0x14f   : > { %v692_v2 = vpop.permute.xlu1 %691  ;;  %v684_v49 = vpop.permute.xlu0 %683 }
 0x150   : > { %v924_v41 = vsel %vm923_vm8, %v907_v10, %v684_v49  ;;  %v928_v60 = vsel %vm923_vm8, %v911_v53, %v692_v2 }
 0x154   : > { %820 = vrot.lane.b32.xlu2 %v789_v26, %s1420_s27 }
 0x155   : > { %812 = vrot.lane.b32.xlu1 %v1763_v11, %s1420_s27  ;;  %767 = vrot.lane.b32.xlu0 %v736_v57, %s1418_s25 }
 0x156   : > { %v636_v29 = vpop.permute.xlu2 %635 }
 0x157   : > { %v738_v54 = vpop.permute.xlu1 %737  ;;  %v660_v50 = vpop.permute.xlu0 %659  ;;  %v908_v25 = vsel %vm906_vm7, %v2046_v35, %v636_v29 }
 0x158   : > { %v941_v51 = vsel %vm940_vm9, %v924_v41, %v738_v54  ;;  %v920_v27 = vsel %vm906_vm7, %v903_v38, %v660_v50 }
 0x159   : > { %v958_v34 = vsel %vm957_vm10, %v941_v51, %v791_v21 }
 0x15a   : > { %1286 = vmatmul.msk.f32.vlgmr.msra.gmra.mxu0 %vm977_vm11, %v958_v34 }
 0x15c   : > { %689 = vrot.lane.b32.xlu2 %v2368_v8, %s1419_s26 }
 0x15d   : > { %647 = vrot.lane.b32.xlu1 %v1729_v55, %s1417_s24  ;;  %639 = vrot.lane.b32.xlu0 %v1712_v42, %s1417_s24  ;;  %v945_v42 = vsel %vm940_vm9, %v928_v60, %v746_v61 }
 0x15e   : > { %v686_v55 = vpop.permute.xlu2 %685 }
 0x15f   : > { %v710_v11 = vpop.permute.xlu1 %709  ;;  %v702_v16 = vpop.permute.xlu0 %701  ;;  %v925_v30 = vsel %vm923_vm8, %v908_v25, %v686_v55 }
 0x160   : > { %v937_v56 = vsel %vm923_vm8, %v920_v27, %v710_v11 }
 0x161   : > { %v954_v58 = vsel %vm940_vm9, %v937_v56, %v764_v46 }
 0x164   : > { %751 = vrot.lane.b32.xlu2 %v2369_v43, %s1418_s25 }
 0x165   : > { %743 = vrot.lane.b32.xlu1 %v2370_v0, %s1418_s25  ;;  %697 = vrot.lane.b32.xlu0 %v1594_v37, %s1419_s26  ;;  %v916_v37 = vsel %vm906_vm7, %v2115_v7, %v2131_v44  ;;  %s2276_s25 = scalar_lea.vmem %s2360_s4, %s1284_s16 }
 0x166   : > { %v933_v5 = vsel %vm923_vm8, %v916_v37, %v702_v16  ;;  %v662_v39 = vpop.permute.xlu2 %661 }
 0x167   : > { %v756_v31 = vpop.permute.xlu1 %755  ;;  %v799_v15 = vpop.permute.xlu0 %798 }
 0x168   : > { %v962_v1 = vsel %vm957_vm10, %v945_v42, %v799_v15  ;;  %v950_v20 = vsel %vm940_vm9, %v933_v5, %v756_v31 }
 0x169   : > { %1290 = vmatmul.msk.f32.vlgmr.msra.gmra.mxu1 %vm977_vm11, %v962_v1 }
 0x16d   : > { %804 = vrot.lane.b32.xlu1 %v1751_v6, %s1420_s27  ;;  %796 = vrot.lane.b32.xlu0 %v1706_v33, %s1420_s27 }
 0x16e   : > { %v704_v33 = vpop.permute.xlu2 %703 }
 0x16f   : > { %v817_v18 = vpop.permute.xlu1 %816  ;;  %v809_v22 = vpop.permute.xlu0 %808 }
 0x170   : > { %v967_v28 = vsel %vm957_vm10, %v950_v20, %v809_v22  ;;  %v971_v52 = vsel %vm957_vm10, %v954_v58, %v817_v18 }
 0x171   : > { %1295 = vmatmul.msk.f32.gmra.mxu2 %vm977_vm11, %v967_v28  ;;  %1299 = vmatmul.msk.f32.gmra.mxu3 %vm977_vm11, %v971_v52 }
 0x176   : > { %v801_v12 = vpop.permute.xlu2 %800 }
 0x177   : > { %v609_v6 = vpop.permute.xlu1 %608  ;;  %v644_v7 = vpop.permute.xlu0 %643 }
 0x178   : > { %v912_v23 = vsel %vm906_vm7, %v2014_v24, %v644_v7  ;;  %v904_v41 = vsel %vm889_vm5, %v2030_v45, %v609_v6 }
 0x179   : > { %v921_v54 = vsel %vm906_vm7, %v904_v41, %v662_v39 }
 0x17e   : > { %v811_v21 = vpop.permute.xlu2 %810 }
 0x17f   : > { %v654_v44 = vpop.permute.xlu1 %653  ;;  %v694_v61 = vpop.permute.xlu0 %693 }
 0x180   : > { %v929_v4 = vsel %vm923_vm8, %v912_v23, %v694_v61  ;;  %v917_v2 = vsel %vm906_vm7, %v2111_v9, %v654_v44 }
 0x181   : > { %v934_v26 = vsel %vm923_vm8, %v917_v2, %v704_v33 }
 0x186   : > { %v646_v57 = vpop.permute.xlu2 %645 }
 0x187   : > { %v748_v32 = vpop.permute.xlu1 %747  ;;  %v740_v36 = vpop.permute.xlu0 %739  ;;  %v913_v42 = vsel %vm906_vm7, %v2098_v40, %v646_v57  ;;  %v2261_v40 = vld [vmem:[%s2359_s3] ss:$0 sm:$0xff] }
 0x188   : > { %v946_v59 = vsel %vm940_vm9, %v929_v4, %v748_v32  ;;  %v942_v47 = vsel %vm940_vm9, %v925_v30, %v740_v36 }
 0x189   : > { %v963_v3 = vsel %vm957_vm10, %v946_v59, %v801_v12 }
 0x18a   : > { %1291 = vmatmul.msk.f32.gmra.mxu1 %vm977_vm11, %v963_v3 }
 0x18e   : > { %v696_v8 = vpop.permute.xlu2 %695 }
 0x18f   : > { %v793_v13 = vpop.permute.xlu1 %792  ;;  %v712_v24 = vpop.permute.xlu0 %711  ;;  %v930_v1 = vsel %vm923_vm8, %v913_v42, %v696_v8 }
 0x190   : > { %v959_v14 = vsel %vm957_vm10, %v942_v47, %v793_v13  ;;  %v938_v50 = vsel %vm923_vm8, %v921_v54, %v712_v24 }
 0x191   : > { %1287 = vmatmul.msk.f32.gmra.mxu0 %vm977_vm11, %v959_v14 }
 0x196   : > { %v742_v45 = vpop.permute.xlu2 %741 }
 0x197   : > { %v766_v49 = vpop.permute.xlu1 %765  ;;  %v758_v46 = vpop.permute.xlu0 %757 }
 0x198   : > { %v951_v35 = vsel %vm940_vm9, %v934_v26, %v758_v46  ;;  %v955_v9 = vsel %vm940_vm9, %v938_v50, %v766_v49 }
 0x199   : > { %v968_v10 = vsel %vm957_vm10, %v951_v35, %v811_v21 }
 0x19a   : > { %1296 = vmatmul.msk.f32.gmra.mxu2 %vm977_vm11, %v968_v10 }
 0x19e   : > { %v714_v43 = vpop.permute.xlu2 %713 }
 0x19f   : > { %v638_v51 = vpop.permute.xlu1 %637  ;;  %v819_v34 = vpop.permute.xlu0 %818 }
 0x1a0   : > { %v972_v29 = vsel %vm957_vm10, %v955_v9, %v819_v34  ;;  %v909_v31 = vsel %vm906_vm7, %v1993_v19, %v638_v51 }
 0x1a1   : > { %1300 = vmatmul.msk.f32.gmra.mxu3 %vm977_vm11, %v972_v29 }
 0x1a6   : > { %v760_v38 = vpop.permute.xlu2 %759 }
 0x1a7   : > { %v688_v11 = vpop.permute.xlu1 %687  ;;  %v611_v16 = vpop.permute.xlu0 %610 }
 0x1a8   : > { %v926_v15 = vsel %vm923_vm8, %v909_v31, %v688_v11  ;;  %v905_v18 = vsel %vm889_vm5, %v1976_v62, %v611_v16 }
 0x1a9   : > { %v943_v27 = vsel %vm940_vm9, %v926_v15, %v742_v45 }
 0x1ae   : > { %v821_v33 = vpop.permute.xlu2 %820 }
 0x1af   : > { %v664_v53 = vpop.permute.xlu1 %663  ;;  %v656_v60 = vpop.permute.xlu0 %655 }
 0x1b0   : > { %v918_v22 = vsel %vm906_vm7, %v2043_v17, %v656_v60  ;;  %v922_v58 = vsel %vm906_vm7, %v905_v18, %v664_v53 }
 0x1b1   : > { %v939_v44 = vsel %vm923_vm8, %v922_v58, %v714_v43 }
 0x1b6   : > { %v690_v21 = vpop.permute.xlu2 %689 }
 0x1b7   : > { %v706_v0 = vpop.permute.xlu1 %705  ;;  %v750_v55 = vpop.permute.xlu0 %749 }
 0x1b8   : > { %v947_v56 = vsel %vm940_vm9, %v930_v1, %v750_v55  ;;  %v935_v39 = vsel %vm923_vm8, %v918_v22, %v706_v0 }
 0x1b9   : > { %v952_v61 = vsel %vm940_vm9, %v935_v39, %v760_v38 }
 0x1be   : > { %v752_v35 = vpop.permute.xlu2 %751 }
 0x1bf   : > { %v803_v37 = vpop.permute.xlu1 %802  ;;  %v795_v5 = vpop.permute.xlu0 %794 }
 0x1c0   : > { %v960_v20 = vsel %vm957_vm10, %v943_v27, %v795_v5  ;;  %v964_v19 = vsel %vm957_vm10, %v947_v56, %v803_v37 }
 0x1c1   : > { %1288 = vmatmul.msk.f32.gmra.mxu0 %vm977_vm11, %v960_v20  ;;  %1292 = vmatmul.msk.f32.gmra.mxu1 %vm977_vm11, %v964_v19 }
 0x1c4   : > { %v1071_v28 = vpop.f32.mrf.mxu2 }
 0x1c5   : > { %v1072_v52 = vadd.f32 %v2261_v40, %v1071_v28  ;;  %v1083_v6 = vpop.f32.mrf.mxu3 }
 0x1c6   : > { %v1084_v7 = vadd.f32 %v2261_v40, %v1083_v6 }
 0x1c7   : > { %vm1103_vm12 = vcmp.ge.f32.partialorder %v1072_v52, 0.0  ;;  %v1119_v62 = vmul.f32 0.2, %v1072_v52  ;;  %v813_v17 = vpop.permute.xlu1 %812  ;;  %v768_v12 = vpop.permute.xlu0 %767 }
 0x1c8   : > { %vm1107_vm13 = vcmp.ge.f32.partialorder %v1084_v7, 0.0  ;;  %v1123_v23 = vmul.f32 0.2, %v1084_v7  ;;  %v956_v4 = vsel %vm940_vm9, %v939_v44, %v768_v12  ;;  %v969_v32 = vsel %vm957_vm10, %v952_v61, %v813_v17 }
 0x1c9   : > { %v1135_v36 = vsel %vm1103_vm12, %v1072_v52, %v1119_v62  ;;  %1297 = vmatmul.msk.f32.gmra.mxu2 %vm977_vm11, %v969_v32  ;;  %v973_v59 = vsel %vm957_vm10, %v956_v4, %v821_v33 }
 0x1ca   : > { %1151 = vst.msk [vmem:[%s2276_s25 + $0x40] sm:$0xff] %vm889_vm5, %v1135_v36  ;;  %v1139_v3 = vsel %vm1107_vm13, %v1084_v7, %v1123_v23  ;;  %1301 = vmatmul.msk.f32.gmra.mxu3 %vm977_vm11, %v973_v59 }
 0x1cb   : > { %1155 = vst.msk [vmem:[%s2276_s25 + $0x60] sm:$0xff] %vm889_vm5, %v1139_v3 }
 0x1cf   : > { %v648_v25 = vpop.permute.xlu1 %647  ;;  %v640_v30 = vpop.permute.xlu0 %639 }
 0x1d0   : > { %v914_v49 = vsel %vm906_vm7, %v2094_v63, %v648_v25  ;;  %v910_v26 = vsel %vm906_vm7, %v2068_v48, %v640_v30 }
 0x1d1   : > { %v927_v10 = vsel %vm923_vm8, %v910_v26, %v690_v21 }
 0x1d7   : > { %v744_v47 = vpop.permute.xlu1 %743  ;;  %v1047_v13 = vpop.f32.mrf.mxu0 }
 0x1d8   : > { %v1048_v24 = vadd.f32 %v2261_v40, %v1047_v13  ;;  %v698_v14 = vpop.permute.xlu0 %697  ;;  %v944_v50 = vsel %vm940_vm9, %v927_v10, %v744_v47 }
 0x1d9   : > { %v931_v57 = vsel %vm923_vm8, %v914_v49, %v698_v14 }
 0x1da   : > { %vm1095_vm14 = vcmp.ge.f32.partialorder %v1048_v24, 0.0  ;;  %v1111_v2 = vmul.f32 0.2, %v1048_v24  ;;  %v948_v41 = vsel %vm940_vm9, %v931_v57, %v752_v35 }
 0x1dc   : > { %v1127_v46 = vsel %vm1095_vm14, %v1048_v24, %v1111_v2 }
 0x1dd   : > { %1143 = vst.msk [vmem:[%s2276_s25] sm:$0xff] %vm889_vm5, %v1127_v46 }
 0x1df   : > { %v805_v54 = vpop.permute.xlu1 %804 }
 0x1e0   : > { %v797_v9 = vpop.permute.xlu0 %796  ;;  %v965_v63 = vsel %vm957_vm10, %v948_v41, %v805_v54 }
 0x1e1   : > { %v961_v51 = vsel %vm957_vm10, %v944_v50, %v797_v9  ;;  %1293 = vmatmul.msk.f32.gmra.mxu1 %vm977_vm11, %v965_v63 }
 0x1e2   : > { %1289 = vmatmul.msk.f32.gmra.mxu0 %vm977_vm11, %v961_v51 }
 0x1e6   : > { %v1059_v48 = vpop.f32.mrf.mxu1 }
 0x1e7   : > { %v1060_v34 = vadd.f32 %v2261_v40, %v1059_v48 }
 0x1e9   : > { %vm1099_vm15 = vcmp.ge.f32.partialorder %v1060_v34, 0.0  ;;  %v1115_v29 = vmul.f32 0.2, %v1060_v34 }
 0x1eb   : > { %v1131_v8 = vsel %vm1099_vm15, %v1060_v34, %v1115_v29 }
 0x1ec   : > { %1147 = vst.msk [vmem:[%s2276_s25 + $0x20] sm:$0xff] %vm889_vm5, %v1131_v8 }
 0x1f4   : > { %v1074_v11 = vpop.f32.mrf.mxu2  ;;  %v1086_v16 = vpop.f32.mrf.mxu3 }
 0x1f5   : > { %v1075_v45 = vadd.f32 %v2261_v40, %v1074_v11  ;;  %v1087_v53 = vadd.f32 %v2261_v40, %v1086_v16 }
 0x1f7   : > { %vm1104_vm0 = vcmp.ge.f32.partialorder %v1075_v45, 0.0  ;;  %v1120_v60 = vmul.f32 0.2, %v1075_v45  ;;  %vm1108_vm1 = vcmp.ge.f32.partialorder %v1087_v53, 0.0  ;;  %v1124_v43 = vmul.f32 0.2, %v1087_v53 }
 0x1f9   : > { %v1136_v0 = vsel %vm1104_vm0, %v1075_v45, %v1120_v60  ;;  %v1140_v55 = vsel %vm1108_vm1, %v1087_v53, %v1124_v43 }
 0x1fa   : > { %1152 = vst.msk [vmem:[%s2276_s25 + $0x48] sm:$0xff] %vm889_vm5, %v1136_v0 }
 0x1fb   : > { %1156 = vst.msk [vmem:[%s2276_s25 + $0x68] sm:$0xff] %vm889_vm5, %v1140_v55 }
 0x207   : > { %v1062_v31 = vpop.f32.mrf.mxu1 }
 0x208   : > { %v1063_v15 = vadd.f32 %v2261_v40, %v1062_v31 }
 0x20a   : > { %vm1100_vm2 = vcmp.ge.f32.partialorder %v1063_v15, 0.0  ;;  %v1116_v42 = vmul.f32 0.2, %v1063_v15 }
 0x20c   : > { %v1132_v1 = vsel %vm1100_vm2, %v1063_v15, %v1116_v42 }
 0x20d   : > { %1148 = vst.msk [vmem:[%s2276_s25 + $0x28] sm:$0xff] %vm889_vm5, %v1132_v1 }
 0x20e   : > { %v1050_v38 = vpop.f32.mrf.mxu0 }
 0x20f   : > { %v1051_v27 = vadd.f32 %v2261_v40, %v1050_v38 }
 0x211   : > { %vm1096_vm3 = vcmp.ge.f32.partialorder %v1051_v27, 0.0  ;;  %v1112_v56 = vmul.f32 0.2, %v1051_v27 }
 0x213   : > { %v1128_v37 = vsel %vm1096_vm3, %v1051_v27, %v1112_v56 }
 0x214   : > { %1144 = vst.msk [vmem:[%s2276_s25 + $0x8] sm:$0xff] %vm889_vm5, %v1128_v37 }
 0x21d   : > { %v1077_v5 = vpop.f32.mrf.mxu2 }
 0x21e   : > { %v1078_v20 = vadd.f32 %v2261_v40, %v1077_v5 }
 0x220   : > { %vm1105_vm4 = vcmp.ge.f32.partialorder %v1078_v20, 0.0  ;;  %v1121_v19 = vmul.f32 0.2, %v1078_v20 }
 0x222   : > { %v1137_v18 = vsel %vm1105_vm4, %v1078_v20, %v1121_v19 }
 0x223   : > { %1153 = vst.msk [vmem:[%s2276_s25 + $0x50] sm:$0xff] %vm889_vm5, %v1137_v18 }
 0x224   : > { %v1089_v22 = vpop.f32.mrf.mxu3 }
 0x225   : > { %v1090_v58 = vadd.f32 %v2261_v40, %v1089_v22 }
 0x227   : > { %vm1109_vm6 = vcmp.ge.f32.partialorder %v1090_v58, 0.0  ;;  %v1125_v39 = vmul.f32 0.2, %v1090_v58 }
 0x229   : > { %v1141_v28 = vsel %vm1109_vm6, %v1090_v58, %v1125_v39 }
 0x22a   : > { %1157 = vst.msk [vmem:[%s2276_s25 + $0x70] sm:$0xff] %vm889_vm5, %v1141_v28 }
 0x23e   : > { %v1053_v52 = vpop.f32.mrf.mxu0  ;;  %v1065_v6 = vpop.f32.mrf.mxu1 }
 0x23f   : > { %v1054_v7 = vadd.f32 %v2261_v40, %v1053_v52  ;;  %v1066_v33 = vadd.f32 %v2261_v40, %v1065_v6 }
 0x241   : > { %vm1097_vm7 = vcmp.ge.f32.partialorder %v1054_v7, 0.0  ;;  %v1113_v44 = vmul.f32 0.2, %v1054_v7  ;;  %vm1101_vm8 = vcmp.ge.f32.partialorder %v1066_v33, 0.0  ;;  %v1117_v61 = vmul.f32 0.2, %v1066_v33 }
 0x243   : > { %v1129_v62 = vsel %vm1097_vm7, %v1054_v7, %v1113_v44  ;;  %v1133_v17 = vsel %vm1101_vm8, %v1066_v33, %v1117_v61 }
 0x244   : > { %1145 = vst.msk [vmem:[%s2276_s25 + $0x10] sm:$0xff] %vm889_vm5, %v1129_v62 }
 0x245   : > { %1149 = vst.msk [vmem:[%s2276_s25 + $0x30] sm:$0xff] %vm889_vm5, %v1133_v17 }
 0x24c   : > { %v1080_v12 = vpop.f32.mrf.mxu2 }
 0x24d   : > { %v1081_v23 = vadd.f32 %v2261_v40, %v1080_v12  ;;  %v1092_v4 = vpop.f32.mrf.mxu3 }
 0x24e   : > { %v1093_v32 = vadd.f32 %v2261_v40, %v1092_v4 }
 0x24f   : > { %vm1106_vm9 = vcmp.ge.f32.partialorder %v1081_v23, 0.0  ;;  %v1122_v36 = vmul.f32 0.2, %v1081_v23 }
 0x250   : > { %vm1110_vm10 = vcmp.ge.f32.partialorder %v1093_v32, 0.0  ;;  %v1126_v59 = vmul.f32 0.2, %v1093_v32 }
 0x251   : > { %v1138_v3 = vsel %vm1106_vm9, %v1081_v23, %v1122_v36 }
 0x252   : > { %1154 = vst.msk [vmem:[%s2276_s25 + $0x58] sm:$0xff] %vm889_vm5, %v1138_v3  ;;  %v1142_v25 = vsel %vm1110_vm10, %v1093_v32, %v1126_v59 }
 0x253   : > { %1158 = vst.msk [vmem:[%s2276_s25 + $0x78] sm:$0xff] %vm889_vm5, %v1142_v25 }
 0x25e   : > { %v1068_v30 = vpop.f32.mrf.mxu1 }
 0x25f   : > { %v1056_v21 = vpop.f32.mrf.mxu0  ;;  %v1069_v47 = vadd.f32 %v2261_v40, %v1068_v30 }
 0x260   : > { %v1057_v13 = vadd.f32 %v2261_v40, %v1056_v21 }
 0x261   : > { %vm1102_vm11 = vcmp.ge.f32.partialorder %v1069_v47, 0.0  ;;  %v1118_v24 = vmul.f32 0.2, %v1069_v47 }
 0x262   : > { %vm1098_vm12 = vcmp.ge.f32.partialorder %v1057_v13, 0.0  ;;  %v1114_v14 = vmul.f32 0.2, %v1057_v13 }
 0x263   : > { %v1134_v2 = vsel %vm1102_vm11, %v1069_v47, %v1118_v24 }
 0x264   : > { %v1130_v49 = vsel %vm1098_vm12, %v1057_v13, %v1114_v14  ;;  %1150 = vst.msk [vmem:[%s2276_s25 + $0x38] sm:$0xff] %vm889_vm5, %v1134_v2 }
 0x265   : > { %1146 = vst.msk [vmem:[%s2276_s25 + $0x18] sm:$0xff] %vm889_vm5, %v1130_v49 }
 0x266 PF: > { %s14_s19 = sadd.s32 1, %s1411_s19   ;;  %s2371_s15 = smov %s1403_s17 }
 0x267   : > { %p11_p9 = scmp.ge.s32.totalorder %s14_s19, 6   ;;  %s2372_s16 = smov %s1407_s18 }
 0x268   : > { %s2373_s17 = smov %s2376_s20  ;;  %s2374_s18 = smov %s2380_s21 }
 0x269   :  { %13 = sbr.rel (!%p11_p9) target bundleno = 3 (0x3), region = 69 }

</bundles_post_ra>
